<compile_context>
chip_gen: v7x
topology: tpu7x:2x2x1
jax: 0.10.0
libtpu: 0.0.40
codegen_flags: <defaults>
</compile_context>

<pallas_src>
import functools
import math

import jax
import jax.numpy as jnp
from jax.experimental import pallas as pl
from jax.experimental.pallas import tpu as pltpu


def _round_up(x, m):
    return (x + m - 1) // m * m


def _cdiv(a, b):
    return -(-a // b)


# ---------------------------------------------------------------------------
# Chip / tile configuration (best effort; all paths have safe fallbacks).
# ---------------------------------------------------------------------------
@functools.lru_cache(maxsize=1)
def _chip_config():
    gen = 0
    num_cores = 1
    vmem_bytes = None
    try:
        kind = jax.devices()[0].device_kind.lower().replace(" ", "")
        if "v7" in kind or "7x" in kind:
            gen = 7
        elif "v6" in kind:
            gen = 6
        elif "v5" in kind:
            gen = 5
        elif "v4" in kind:
            gen = 4
        if gen >= 7:
            num_cores = 2  # v7x: 2 TensorCores per chip
    except Exception:
        pass
    try:
        info = pltpu.get_tpu_info()
        v = getattr(info, "vmem_capacity_bytes", None)
        if v:
            vmem_bytes = int(v)
    except Exception:
        pass
    if vmem_bytes is None:
        # Conservative fallback: 128 MiB for known v5e/v6e, 64 MiB otherwise.
        vmem_bytes = (128 << 20) if gen in (4, 5, 6) else (64 << 20)

    # Leave headroom below physical VMEM for compiler/internal scratch.
    vmem_cap = int(0.84 * vmem_bytes)      # ~107 MiB @128 MiB, ~54 MiB @64 MiB
    work_budget = int(0.72 * vmem_bytes)   # ~92 MiB @128 MiB,  ~46 MiB @64 MiB

    # Token-tile upper bound per arithmetic-intensity knee:
    #   v5e knee ~240 FLOP/B -> 512 is plenty; v6e ~650-700 -> 1024;
    #   v7x ~311 but only 64 MiB VMEM -> 512.
    if gen == 6:
        tm_max = 1024
    else:
        tm_max = 512

    te_max = 512 if vmem_bytes >= (96 << 20) else 256
    return dict(gen=gen, num_cores=num_cores, vmem_bytes=vmem_bytes,
                vmem_cap=vmem_cap, work_budget=work_budget,
                tm_max=tm_max, te_max=te_max)


def pick_expert_tile(model_dim, expert_dim, chip=None):
    """Largest multiple of 128 (<= per-chip te_max) dividing round_up(E, 128)."""
    del model_dim
    chip = chip or _chip_config()
    e_pad = _round_up(expert_dim, 128)
    te = max((min(chip["te_max"], e_pad) // 128) * 128, 128)
    while e_pad % te != 0:
        te -= 128
    return te


def _vmem_working_set(tm, te, model_dim):
    bf16, f32 = 2, 4
    return (
        2 * tm * model_dim * bf16          # x tile (double-buffered)
        + 2 * model_dim * 2 * te * bf16    # fused gate|up weight tile
        + 2 * te * model_dim * bf16        # down weight tile
        + 2 * tm * model_dim * bf16        # output tile
        + tm * model_dim * f32             # f32 accumulator scratch
        + tm * 2 * te * f32 + 2 * tm * te * bf16   # gu (f32) + g/u/h temps
    )


def _pick_token_tile(tokens, model_dim, te, chip):
    # Largest tm (multiple of 16 for bf16 sublane packing) fitting the budget.
    budget = chip["work_budget"]
    tm_fit = 16
    for tm in list(range(chip["tm_max"], 127, -128)) + [64, 32, 16]:
        if _vmem_working_set(tm, te, model_dim) <= budget:
            tm_fit = tm
            break

    # Even split of tokens over the tile count implied by tm_fit (minimizes
    # padding waste); on 2-TC chips force >=2 token tiles so the "parallel"
    # grid axis shards across both TensorCores.
    n_tok = _cdiv(tokens, tm_fit)
    if chip["num_cores"] >= 2 and n_tok < 2 and tokens > 16:
        n_tok = 2
    tm_eff = min(_round_up(_cdiv(tokens, n_tok), 16), max(tm_fit, 16))
    n_tok = _cdiv(tokens, tm_eff)
    tokens_padded = n_tok * tm_eff
    return tm_eff, n_tok, tokens_padded


# ---------------------------------------------------------------------------
# One-time weight preparation (call OUTSIDE the per-forward jit).
# ---------------------------------------------------------------------------
def prepare_mlp_weights(w_gate, w_up, w_down, *, te=None):
    """w_gate/w_up: [E, D] (torch Linear layout), w_down: [D, E] -> here [E_in=expert]
    stored as torch [out=D, in=E]. Returns (wgu [D, 2*E_pad], wd_t [E_pad, D], te).
    E is zero-padded to a 128-multiple so the kernel always stays in the tiled
    regime; padded expert columns contribute exactly zero."""
    expert_dim, model_dim = w_gate.shape
    chip = _chip_config()
    if te is None:
        te = pick_expert_tile(model_dim, expert_dim, chip)
    e_pad = _round_up(expert_dim, te)
    assert e_pad % te == 0 and te % 128 == 0

    if e_pad != expert_dim:
        pad = e_pad - expert_dim
        w_gate = jnp.pad(w_gate, ((0, pad), (0, 0)))
        w_up = jnp.pad(w_up, ((0, pad), (0, 0)))
        w_down = jnp.pad(w_down, ((0, 0), (0, pad)))

    n_e = e_pad // te
    wg_t = jnp.transpose(w_gate)   # (D, E_pad)
    wu_t = jnp.transpose(w_up)     # (D, E_pad)
    # Tile-interleave so block e (width 2*te) = [gate cols of tile e | up cols].
    wgu = jnp.concatenate(
        [wg_t.reshape(model_dim, n_e, 1, te),
         wu_t.reshape(model_dim, n_e, 1, te)],
        axis=2,
    ).reshape(model_dim, 2 * e_pad)
    wd_t = jnp.transpose(w_down)   # (E_pad, D)
    return wgu, wd_t, te


# ---------------------------------------------------------------------------
# Kernel
# ---------------------------------------------------------------------------
def mlp_kernel(x_ref, wgu_ref, wd_ref, o_ref, acc_ref):
    # x_ref:   (tm, D)    bf16
    # wgu_ref: (D, 2*te)  bf16   [gate | up] columns of this E-tile
    # wd_ref:  (te, D)    bf16
    # o_ref:   (tm, D)    bf16
    # acc_ref: (tm, D)    f32 scratch, resident across the E grid axis
    e = pl.program_id(1)
    te = wd_ref.shape[0]

    @pl.when(e == 0)
    def _():
        acc_ref[...] = jnp.zeros_like(acc_ref)

    x = x_ref[...]

    # Fused gate+up projection: one MXU pass with N = 2*te, f32 accumulation.
    gu = jnp.dot(x, wgu_ref[...], preferred_element_type=jnp.float32)  # (tm, 2te)

    # Round to bf16 first to match torch's bf16-Linear outputs, then SiLU.
    g = gu[:, :te].astype(jnp.bfloat16)
    u = gu[:, te:].astype(jnp.bfloat16)
    gf = g.astype(jnp.float32)
    h = (gf * jax.nn.sigmoid(gf)).astype(jnp.bfloat16) * u               # (tm, te)

    # Partial down-projection for this E-tile, accumulated in f32.
    acc_ref[...] += jnp.dot(h, wd_ref[...], preferred_element_type=jnp.float32)

    @pl.when(e == pl.num_programs(1) - 1)
    def _():
        o_ref[...] = acc_ref[...].astype(o_ref.dtype)


# ---------------------------------------------------------------------------
# Forward wrapper
# ---------------------------------------------------------------------------
@functools.partial(
    jax.jit,
    static_argnames=("te", "tm_eff", "n_tok", "tokens_padded", "vmem_limit"))
def _mlp_call(x2d, wgu, wd_t, *, te, tm_eff, n_tok, tokens_padded, vmem_limit):
    tokens, model_dim = x2d.shape
    expert_dim_p = wd_t.shape[0]
    n_e = expert_dim_p // te

    if tokens_padded != tokens:
        # TODO(synk): mask the ragged last token tile in-kernel instead of this
        # wrapper-side pad/slice (one extra HBM round-trip of x / out).
        x2d = jnp.pad(x2d, ((0, tokens_padded - tokens), (0, 0)))

    bf16 = 2
    cost = pl.CostEstimate(
        flops=6 * tokens_padded * model_dim * expert_dim_p,
        transcendentals=tokens_padded * expert_dim_p,
        bytes_accessed=(
            tokens_padded * model_dim * bf16                  # x read
            + tokens_padded * model_dim * bf16                # out write
            + n_tok * 3 * model_dim * expert_dim_p * bf16     # weight streams
        ),
    )

    out = pl.pallas_call(
        mlp_kernel,
        out_shape=jax.ShapeDtypeStruct((tokens_padded, model_dim), jnp.bfloat16),
        grid_spec=pltpu.PrefetchScalarGridSpec(
            num_scalar_prefetch=0,
            grid=(n_tok, n_e),
            in_specs=[
                pl.BlockSpec((tm_eff, model_dim), lambda i, e: (i, 0)),
                pl.BlockSpec((model_dim, 2 * te), lambda i, e: (0, e)),
                pl.BlockSpec((te, model_dim), lambda i, e: (e, 0)),
            ],
            out_specs=pl.BlockSpec((tm_eff, model_dim), lambda i, e: (i, 0)),
            scratch_shapes=[pltpu.VMEM((tm_eff, model_dim), jnp.float32)],
        ),
        compiler_params=pltpu.CompilerParams(
            dimension_semantics=("parallel", "arbitrary"),
            vmem_limit_bytes=vmem_limit,
        ),
        cost_estimate=cost,
    )(x2d, wgu, wd_t)

    if tokens_padded != tokens:
        out = out[:tokens]
    return out


def mlp_pallas_forward(x, wgu, wd_t, *, te=None):
    """x: [..., model_dim] bf16. wgu/wd_t/te from prepare_mlp_weights."""
    chip = _chip_config()
    orig_shape = x.shape
    model_dim = orig_shape[-1]
    expert_dim_p = wd_t.shape[0]
    if te is None:
        te = pick_expert_tile(model_dim, expert_dim_p, chip)
    assert wgu.shape == (model_dim, 2 * expert_dim_p)
    assert expert_dim_p % te == 0 and te % 128 == 0

    tokens = int(math.prod(orig_shape[:-1])) if len(orig_shape) > 1 else 1
    tm_eff, n_tok, tokens_padded = _pick_token_tile(tokens, model_dim, te, chip)

    ws = _vmem_working_set(tm_eff, te, model_dim)
    vmem_limit = min(max(int(1.25 * ws), 32 << 20), chip["vmem_cap"])
    if vmem_limit < int(1.1 * ws):       # never clamp below the working set
        vmem_limit = int(1.1 * ws)

    out = _mlp_call(x.reshape(tokens, model_dim), wgu, wd_t,
                    te=te, tm_eff=tm_eff, n_tok=n_tok,
                    tokens_padded=tokens_padded, vmem_limit=int(vmem_limit))
    return out.reshape(orig_shape)


# ---------------------------------------------------------------------------
def init_linear_weight(key, out_dim, in_dim):
    # nn.Linear default init: U(-1/sqrt(fan_in), 1/sqrt(fan_in)); stored [out, in].
    bound = 1.0 / (in_dim ** 0.5)
    return jax.random.uniform(
        key, (out_dim, in_dim), minval=-bound, maxval=bound, dtype=jnp.float32
    ).astype(jnp.bfloat16)


if __name__ == "__main__":
    model_dim = 128
    expert_dim = 256
    batch, seq = 2, 8

    key = jax.random.PRNGKey(0)
    kx, kg, ku, kd = jax.random.split(key, 4)

    x = jax.random.normal(kx, (batch, seq, model_dim), dtype=jnp.float32).astype(
        jnp.bfloat16
    )
    w_gate = init_linear_weight(kg, expert_dim, model_dim)  # (E, D)
    w_up = init_linear_weight(ku, expert_dim, model_dim)    # (E, D)
    w_down = init_linear_weight(kd, model_dim, expert_dim)  # (D, E)

    # One-time weight prep (outside the per-forward jit).
    wgu, wd_t, te = prepare_mlp_weights(w_gate, w_up, w_down)
    wgu, wd_t = jax.block_until_ready((wgu, wd_t))

    out = mlp_pallas_forward(x, wgu, wd_t, te=te)
    jax.block_until_ready(out)

    # Pure-JAX reference of the SwiGLU MLP semantics (bf16 linears, f32 accum).
    xf = x.astype(jnp.float32)
    g_ref = (xf @ w_gate.astype(jnp.float32).T).astype(jnp.bfloat16)
    u_ref = (xf @ w_up.astype(jnp.float32).T).astype(jnp.bfloat16)
    h_ref = jax.nn.silu(g_ref.astype(jnp.float32)).astype(jnp.bfloat16) * u_ref
    ref = (h_ref.astype(jnp.float32) @ w_down.astype(jnp.float32).T).astype(
        jnp.bfloat16
    )
    assert out.shape == ref.shape and out.dtype == jnp.bfloat16
    err = jnp.max(jnp.abs(out.astype(jnp.float32) - ref.astype(jnp.float32)))
    assert float(err) < 5e-2, f"max abs err {float(err)}"

    print("KERNEL_OK")
</pallas_src>

<mosaic_0001>
module attributes {stable_mosaic.version = 11 : i64} {
  func.func @mlp_kernel(%arg0: i32, %arg1: i32, %arg2: memref<16x128xbf16, #tpu.memory_space<vmem>>, %arg3: memref<128x512xbf16, #tpu.memory_space<vmem>>, %arg4: memref<256x128xbf16, #tpu.memory_space<vmem>>, %arg5: memref<16x128xbf16, #tpu.memory_space<vmem>>, %arg6: memref<16x128xf32, #tpu.memory_space<vmem>>) attributes {dimension_semantics = [#tpu.dimension_semantics<parallel>, #tpu.dimension_semantics<arbitrary>], iteration_bounds = array<i64: 1, 1>, scalar_prefetch = 0 : i64, scratch_operands = 1 : i64, tpu.core_type = #tpu.core_type<tc>, window_params = [{transform_indices = @transform_0, window_bounds = array<i64: 16, 128>}, {transform_indices = @transform_1, window_bounds = array<i64: 128, 512>}, {transform_indices = @transform_2, window_bounds = array<i64: 256, 128>}, {transform_indices = @transform_3, window_bounds = array<i64: 16, 128>}]} {
    %c0_i32 = arith.constant 0 : i32
    %0 = arith.cmpi eq, %arg1, %c0_i32 : i32
    %1 = arith.extui %0 : i1 to i32
    %c0_i32_0 = arith.constant 0 : i32
    %2 = arith.cmpi ne, %1, %c0_i32_0 : i32
    scf.if %2 {
      %cst_14 = arith.constant 0.000000e+00 : f32
      %27 = vector.broadcast %cst_14 : f32 to vector<16x128xf32>
      %c0_15 = arith.constant 0 : index
      %c0_16 = arith.constant 0 : index
      %28 = vector.load %arg6[%c0_15, %c0_16] : memref<16x128xf32, #tpu.memory_space<vmem>>, vector<16x128xf32>
      tpu.vector_store %arg6[%c0_15, %c0_16], %27 {strides = array<i32>} : memref<16x128xf32, #tpu.memory_space<vmem>>, vector<16x128xf32>,
    } else {
    }
    %c0 = arith.constant 0 : index
    %c0_1 = arith.constant 0 : index
    %3 = vector.load %arg2[%c0, %c0_1] : memref<16x128xbf16, #tpu.memory_space<vmem>>, vector<16x128xbf16>
    %c0_2 = arith.constant 0 : index
    %c0_3 = arith.constant 0 : index
    %4 = vector.load %arg3[%c0_2, %c0_3] : memref<128x512xbf16, #tpu.memory_space<vmem>>, vector<128x512xbf16>
    %cst = arith.constant dense<0.000000e+00> : vector<16x512xf32>
    %5 = tpu.matmul %3, %4, %cst {dimension_numbers = #tpu.dot_dimension_numbers<[1], [0], [0], [1], [0, 0, 1, 1], [], []>} : vector<16x128xbf16>, vector<128x512xbf16>, vector<16x512xf32> -> vector<16x512xf32>
    %6 = vector.extract_strided_slice %5 {offsets = [0, 0], sizes = [16, 256], strides = [1, 1]} : vector<16x512xf32> to vector<16x256xf32>
    %7 = arith.truncf %6 : vector<16x256xf32> to vector<16x256xbf16>
    %8 = vector.extract_strided_slice %5 {offsets = [0, 256], sizes = [16, 256], strides = [1, 1]} : vector<16x512xf32> to vector<16x256xf32>
    %9 = arith.truncf %8 : vector<16x256xf32> to vector<16x256xbf16>
    %10 = arith.extf %7 : vector<16x256xbf16> to vector<16x256xf32>
    %11 = arith.negf %10 : vector<16x256xf32>
    %12 = math.exp %11 : vector<16x256xf32>
    %cst_4 = arith.constant 1.000000e+00 : f32
    %13 = vector.broadcast %cst_4 : f32 to vector<16x256xf32>
    %14 = arith.addf %13, %12 : vector<16x256xf32>
    %15 = arith.divf %13, %14 : vector<16x256xf32>
    %16 = arith.mulf %10, %15 : vector<16x256xf32>
    %17 = arith.truncf %16 : vector<16x256xf32> to vector<16x256xbf16>
    %18 = arith.mulf %17, %9 : vector<16x256xbf16>
    %c0_5 = arith.constant 0 : index
    %c0_6 = arith.constant 0 : index
    %19 = vector.load %arg6[%c0_5, %c0_6] : memref<16x128xf32, #tpu.memory_space<vmem>>, vector<16x128xf32>
    %c0_7 = arith.constant 0 : index
    %c0_8 = arith.constant 0 : index
    %20 = vector.load %arg4[%c0_7, %c0_8] : memref<256x128xbf16, #tpu.memory_space<vmem>>, vector<256x128xbf16>
    %cst_9 = arith.constant dense<0.000000e+00> : vector<16x128xf32>
    %21 = tpu.matmul %18, %20, %cst_9 {dimension_numbers = #tpu.dot_dimension_numbers<[1], [0], [0], [1], [0, 0, 1, 1], [], []>} : vector<16x256xbf16>, vector<256x128xbf16>, vector<16x128xf32> -> vector<16x128xf32>
    %22 = arith.addf %19, %21 : vector<16x128xf32>
    %c0_10 = arith.constant 0 : index
    %c0_11 = arith.constant 0 : index
    %23 = vector.load %arg6[%c0_10, %c0_11] : memref<16x128xf32, #tpu.memory_space<vmem>>, vector<16x128xf32>
    tpu.vector_store %arg6[%c0_10, %c0_11], %22 {strides = array<i32>} : memref<16x128xf32, #tpu.memory_space<vmem>>, vector<16x128xf32>,
    %c0_i32_12 = arith.constant 0 : i32
    %24 = arith.cmpi eq, %arg1, %c0_i32_12 : i32
    %25 = arith.extui %24 : i1 to i32
    %c0_i32_13 = arith.constant 0 : i32
    %26 = arith.cmpi ne, %25, %c0_i32_13 : i32
    scf.if %26 {
      %c0_14 = arith.constant 0 : index
      %c0_15 = arith.constant 0 : index
      %27 = vector.load %arg6[%c0_14, %c0_15] : memref<16x128xf32, #tpu.memory_space<vmem>>, vector<16x128xf32>
      %28 = arith.truncf %27 : vector<16x128xf32> to vector<16x128xbf16>
      %c0_16 = arith.constant 0 : index
      %c0_17 = arith.constant 0 : index
      %29 = vector.load %arg5[%c0_16, %c0_17] : memref<16x128xbf16, #tpu.memory_space<vmem>>, vector<16x128xbf16>
      tpu.vector_store %arg5[%c0_16, %c0_17], %28 {strides = array<i32>} : memref<16x128xbf16, #tpu.memory_space<vmem>>, vector<16x128xbf16>,
    } else {
    }
    return
  }
  func.func @transform_0(%arg0: i32, %arg1: i32) -> (i32, i32) {
    %c0_i32 = arith.constant 0 : i32
    %c0_i32_0 = arith.constant 0 : i32
    return %arg0, %c0_i32 : i32, i32
  }
  func.func @transform_1(%arg0: i32, %arg1: i32) -> (i32, i32) {
    %c0_i32 = arith.constant 0 : i32
    %c0_i32_0 = arith.constant 0 : i32
    return %c0_i32, %arg1 : i32, i32
  }
  func.func @transform_2(%arg0: i32, %arg1: i32) -> (i32, i32) {
    %c0_i32 = arith.constant 0 : i32
    %c0_i32_0 = arith.constant 0 : i32
    return %arg1, %c0_i32 : i32, i32
  }
  func.func @transform_3(%arg0: i32, %arg1: i32) -> (i32, i32) {
    %c0_i32 = arith.constant 0 : i32
    %c0_i32_0 = arith.constant 0 : i32
    return %arg0, %c0_i32 : i32, i32
  }
}

</mosaic_0001>

<bundles_post_ra>
// kernel: _mlp_call.1
= control target key start
LH: loop header
LB: loop body
LE: loop exit
PB: predicated region body
PF: predicated region fallthrough
CT: control target
= control target key end

     0   :  { %8 = vsyncpa [#allocation4], 0  ;;  %s951_s0 = inlined_call_operand.hbm [shape: bf16[16,128], index: 0, kind: input, shape index: {}]   ;;  %s952_s1 = inlined_call_operand.hbm [shape: bf16[128,512], index: 1, kind: input, shape index: {}]   ;;  %s953_s2 = inlined_call_operand.hbm [shape: bf16[256,128], index: 2, kind: input, shape index: {}]   ;;  %s954_s3 = inlined_call_operand.hbm [shape: bf16[16,128], index: 3, kind: output, shape index: {}]  }
   0x1   :  { %9 = vsyncpa [#allocation7], 0 }
   0x2   :  { %10 = vsyncpa [#allocation5], 0  ;;  %s865_s12 = smov [#allocation6]   ;;  %s771_s16 = scalar_lea.hbm %s952_s1, 4096 }
   0x3   :  { %s28_s13 = sshll.u32 %s865_s12, 4  ;;  %p772_p0 = scmp.ne.s32.totalorder %s952_s1, %s771_s16  ;;  %s29_s13 = int_to_ptr.vmem [resolvable:$true] %s28_s13 }
   0x4   :  { %p775_p1 = scmp.lt.u32.totalorder %s771_s16, %s952_s1 }
   0x6   :  { %p777_p2 = pnand %p775_p1, %p772_p0 }
   0x8   :  { %780 = shalt.err (!%p777_p2)
}
   0x9   :  { %s781_s21 = scalar_lea.vmem %s29_s13, 4096  ;;  %p786_p4 = scmp.lt.s32.totalorder %s29_s13, %s29_s13 }
   0xa   :  { %p782_p3 = scmp.ne.s32.totalorder %s29_s13, %s781_s21  ;;  %p787_p5 = scmp.lt.s32.totalorder %s781_s21, %s781_s21 }
   0xc   :  { %p788_p6 = por %p787_p5, %p786_p4 }
   0xe   :  { %p789_p7 = pnand %p788_p6, %p782_p3 }
  0x10   :  { %792 = shalt.err (!%p789_p7)
}
  0x11   :  { %s866_s22 = smov 256   ;;  %s867_s23 = smov 16  }
  0x12   :  { %34 = dma.hbm_to_vmem [thread:$0]  %s952_s1, 4096, %s29_s13, [#allocation7], %s866_s22, %s866_s22, %s867_s23  }
  0x13   :  { %s868_s26 = smov [#allocation3]   ;;  %s793_s30 = scalar_lea.hbm %s951_s0, 128 }
  0x14   :  { %s16_s27 = sshll.u32 %s868_s26, 4  ;;  %p794_p8 = scmp.ne.s32.totalorder %s951_s0, %s793_s30  ;;  %s17_s27 = int_to_ptr.vmem [resolvable:$true] %s16_s27 }
  0x15   :  { %p797_p9 = scmp.lt.u32.totalorder %s793_s30, %s951_s0 }
  0x17   :  { %p799_p10 = pnand %p797_p9, %p794_p8 }
  0x19   :  { %802 = shalt.err (!%p799_p10)
}
  0x1a   :  { %s803_s8 = scalar_lea.vmem %s17_s27, 128  ;;  %p808_p12 = scmp.lt.s32.totalorder %s17_s27, %s17_s27 }
  0x1b   :  { %p804_p11 = scmp.ne.s32.totalorder %s17_s27, %s803_s8  ;;  %p809_p13 = scmp.lt.s32.totalorder %s803_s8, %s803_s8 }
  0x1d   :  { %p810_p0 = por %p809_p13, %p808_p12 }
  0x1f   :  { %p811_p1 = pnand %p810_p0, %p804_p11 }
  0x21   :  { %814 = shalt.err (!%p811_p1)
}
  0x22   :  { %s869_s1 = smov 64   ;;  %s870_s9 = smov 4  }
  0x23   :  { %22 = dma.hbm_to_vmem [thread:$0]  %s951_s0, 128, %s17_s27, [#allocation4], %s869_s1, %s869_s1, %s870_s9  }
  0x24   :  { %s871_s12 = smov [#allocation8]   ;;  %s815_s16 = scalar_lea.hbm %s953_s2, 2048 }
  0x25   :  { %s40_s13 = sshll.u32 %s871_s12, 4  ;;  %p816_p2 = scmp.ne.s32.totalorder %s953_s2, %s815_s16  ;;  %s41_s13 = int_to_ptr.vmem [resolvable:$true] %s40_s13 }
  0x26   :  { %p819_p3 = scmp.lt.u32.totalorder %s815_s16, %s953_s2 }
  0x28   :  { %p821_p4 = pnand %p819_p3, %p816_p2 }
  0x2a   :  { %824 = shalt.err (!%p821_p4)
}
  0x2b   :  { %s825_s21 = scalar_lea.vmem %s41_s13, 2048  ;;  %p830_p6 = scmp.lt.s32.totalorder %s41_s13, %s41_s13 }
  0x2c   :  { %p826_p5 = scmp.ne.s32.totalorder %s41_s13, %s825_s21  ;;  %p831_p7 = scmp.lt.s32.totalorder %s825_s21, %s825_s21 }
  0x2e   :  { %p832_p8 = por %p831_p7, %p830_p6 }
  0x30   :  { %p833_p9 = pnand %p832_p8, %p826_p5 }
  0x32   :  { %836 = shalt.err (!%p833_p9)
}
  0x33   :  { %46 = dma.hbm_to_vmem [thread:$0]  %s953_s2, 2048, %s41_s13, [#allocation7], %s869_s1, %s869_s1, %s870_s9  }
  0x34   :  { %859 = dma.done.wait [#allocation4], 128  }
  0x35   :  { %860 = vsyncadd [#allocation4], 4294967168 }
  0x36   :  { %861 = dma.done.wait [#allocation7], 6144  }
  0x37   :  { %862 = vsyncadd [#allocation7], 4294961152  ;;  %v872_v0 = vmov 0   ;;  %v690_v1 = vld [vmem:[#allocation6 + $0x4] ss:$16 sps:$4 sm:$0xff]   ;;  %v717_v28 = vld [vmem:[#allocation3] sm:$0xff]  }
  0x38   :  { %295 = vmatprep.mubr.bf16.mxu0 %v872_v0  ;;  %338 = vmatprep.mubr.bf16.mxu1 %v872_v0  ;;  %v692_v2 = vld [vmem:[#allocation6] ss:$16 sps:$4 sm:$0xff]   ;;  %v693_v3 = vld [vmem:[#allocation6 + $0x24] ss:$16 sps:$4 sm:$0xff]   ;;  %v714_v9 = vld [vmem:[#allocation6 + $0xc] ss:$16 sps:$4 sm:$0xff]  }
  0x39   :  { %263 = vmatprep.subr.bf16.mxu0 %v690_v1  ;;  %v695_v4 = vld [vmem:[#allocation6 + $0x20] ss:$16 sps:$4 sm:$0xff]   ;;  %v696_v5 = vld [vmem:[#allocation6 + $0x44] ss:$16 sps:$4 sm:$0xff]   ;;  %v716_v10 = vld [vmem:[#allocation6 + $0x8] ss:$16 sps:$4 sm:$0xff]   ;;  %306 = vmatprep.subr.bf16.mxu1 %v714_v9 }
  0x3a   :  { %264 = vmatpush1.bf16.msra.mxu0 %v692_v2  ;;  %v698_v6 = vld [vmem:[#allocation6 + $0x40] ss:$16 sps:$4 sm:$0xff]   ;;  %v699_v7 = vld [vmem:[#allocation6 + $0x64] ss:$16 sps:$4 sm:$0xff]   ;;  %v718_v12 = vld [vmem:[#allocation6 + $0x2c] ss:$16 sps:$4 sm:$0xff]   ;;  %307 = vmatpush1.bf16.msra.mxu1 %v716_v10 }
  0x3b   :  { %265 = vmatprep.subr.bf16.mxu0 %v693_v3  ;;  %v701_v8 = vld [vmem:[#allocation6 + $0x60] ss:$16 sps:$4 sm:$0xff]   ;;  %v702_v11 = vld [vmem:[#allocation6 + $0x84] ss:$16 sps:$4 sm:$0xff]   ;;  %v720_v13 = vld [vmem:[#allocation6 + $0x28] ss:$16 sps:$4 sm:$0xff]   ;;  %308 = vmatprep.subr.bf16.mxu1 %v718_v12 }
  0x3c   :  { %v704_v14 = vld [vmem:[#allocation6 + $0x80] ss:$16 sps:$4 sm:$0xff]   ;;  %v721_v15 = vld [vmem:[#allocation6 + $0x4c] ss:$16 sps:$4 sm:$0xff]   ;;  %v705_v16 = vld [vmem:[#allocation6 + $0xa4] ss:$16 sps:$4 sm:$0xff]  }
  0x3d   :  { %v723_v17 = vld [vmem:[#allocation6 + $0x48] ss:$16 sps:$4 sm:$0xff]   ;;  %v707_v18 = vld [vmem:[#allocation6 + $0xa0] ss:$16 sps:$4 sm:$0xff]   ;;  %v724_v19 = vld [vmem:[#allocation6 + $0x6c] ss:$16 sps:$4 sm:$0xff]  }
  0x3e   :  { %266 = vmatpush1.bf16.msra.mxu0 %v695_v4  ;;  %309 = vmatpush1.bf16.msra.mxu1 %v720_v13  ;;  %v708_v20 = vld [vmem:[#allocation6 + $0xc4] ss:$16 sps:$4 sm:$0xff]   ;;  %v710_v21 = vld [vmem:[#allocation6 + $0xc0] ss:$16 sps:$4 sm:$0xff]   ;;  %v726_v22 = vld [vmem:[#allocation6 + $0x68] ss:$16 sps:$4 sm:$0xff]  }
  0x3f   :  { %267 = vmatprep.subr.bf16.mxu0 %v696_v5  ;;  %310 = vmatprep.subr.bf16.mxu1 %v721_v15  ;;  %v711_v23 = vld [vmem:[#allocation6 + $0xe4] ss:$16 sps:$4 sm:$0xff]   ;;  %v727_v24 = vld [vmem:[#allocation6 + $0x8c] ss:$16 sps:$4 sm:$0xff]   ;;  %v729_v25 = vld [vmem:[#allocation6 + $0x88] ss:$16 sps:$4 sm:$0xff]  }
  0x40   :  { %v713_v26 = vld [vmem:[#allocation6 + $0xe0] ss:$16 sps:$4 sm:$0xff]   ;;  %v730_v27 = vld [vmem:[#allocation6 + $0xac] ss:$16 sps:$4 sm:$0xff]   ;;  %v732_v29 = vld [vmem:[#allocation6 + $0xa8] ss:$16 sps:$4 sm:$0xff]  }
  0x41   :  { %v733_v30 = vld [vmem:[#allocation6 + $0xcc] ss:$16 sps:$4 sm:$0xff]   ;;  %v735_v31 = vld [vmem:[#allocation6 + $0xc8] ss:$16 sps:$4 sm:$0xff]   ;;  %v739_v34 = vld [vmem:[#allocation8 + $0x40] sm:$0xff]   ;;  %s873_s2 = smov [#allocation9]  }
  0x42   :  { %268 = vmatpush1.bf16.msra.mxu0 %v698_v6  ;;  %311 = vmatpush1.bf16.msra.mxu1 %v723_v17  ;;  %v736_v32 = vld [vmem:[#allocation6 + $0xec] ss:$16 sps:$4 sm:$0xff]   ;;  %v738_v33 = vld [vmem:[#allocation6 + $0xe8] ss:$16 sps:$4 sm:$0xff]   ;;  %v740_v35 = vld [vmem:[#allocation8] sm:$0xff]   ;;  %s584_s23 = sshll.u32 %s873_s2, 4  ;;  %s585_s23 = int_to_ptr.vmem [resolvable:$true] %s584_s23 }
  0x43   :  { %269 = vmatprep.subr.bf16.mxu0 %v699_v7  ;;  %312 = vmatprep.subr.bf16.mxu1 %v724_v19  ;;  %v741_v36 = vld [vmem:[#allocation8 + $0x48] sm:$0xff]   ;;  %v743_v38 = vld [vmem:[#allocation8 + $0x50] sm:$0xff]   ;;  %v745_v40 = vld [vmem:[#allocation8 + $0x58] sm:$0xff]   ;;  %s837_s24 = scalar_lea.vmem %s585_s23, 128  ;;  %p842_p11 = scmp.lt.s32.totalorder %s585_s23, %s585_s23 }
  0x44   :  { %v742_v37 = vld [vmem:[#allocation8 + $0x8] sm:$0xff]   ;;  %v744_v39 = vld [vmem:[#allocation8 + $0x10] sm:$0xff]   ;;  %v746_v41 = vld [vmem:[#allocation8 + $0x18] sm:$0xff]   ;;  %p838_p10 = scmp.ne.s32.totalorder %s585_s23, %s837_s24  ;;  %p843_p12 = scmp.lt.s32.totalorder %s837_s24, %s837_s24 }
  0x45   :  { %v747_v42 = vld [vmem:[#allocation8 + $0x60] sm:$0xff]   ;;  %v749_v44 = vld [vmem:[#allocation8 + $0x68] sm:$0xff]   ;;  %v751_v46 = vld [vmem:[#allocation8 + $0x70] sm:$0xff]  }
  0x46   :  { %270 = vmatpush1.bf16.msra.mxu0 %v701_v8  ;;  %313 = vmatpush1.bf16.msra.mxu1 %v726_v22  ;;  %v748_v43 = vld [vmem:[#allocation8 + $0x20] sm:$0xff]   ;;  %v750_v45 = vld [vmem:[#allocation8 + $0x28] sm:$0xff]   ;;  %v752_v47 = vld [vmem:[#allocation8 + $0x30] sm:$0xff]   ;;  %p844_p13 = por %p843_p12, %p842_p11 }
  0x47   :  { %271 = vmatprep.subr.bf16.mxu0 %v702_v11  ;;  %314 = vmatprep.subr.bf16.mxu1 %v727_v24  ;;  %v753_v48 = vld [vmem:[#allocation8 + $0x78] sm:$0xff]  }
  0x48   :  { %v754_v49 = vld [vmem:[#allocation8 + $0x38] sm:$0xff]   ;;  %p845_p0 = pnand %p844_p13, %p838_p10 }
  0x4a   :  { %272 = vmatpush1.bf16.msra.mxu0 %v704_v14  ;;  %315 = vmatpush1.bf16.msra.mxu1 %v729_v25 }
  0x4b   :  { %273 = vmatprep.subr.bf16.mxu0 %v705_v16  ;;  %316 = vmatprep.subr.bf16.mxu1 %v730_v27 }
  0x4e   :  { %274 = vmatpush1.bf16.msra.mxu0 %v707_v18  ;;  %317 = vmatpush1.bf16.msra.mxu1 %v732_v29 }
  0x4f   :  { %275 = vmatprep.subr.bf16.mxu0 %v708_v20  ;;  %318 = vmatprep.subr.bf16.mxu1 %v733_v30 }
  0x52   :  { %276 = vmatpush1.bf16.msra.mxu0 %v710_v21  ;;  %319 = vmatpush1.bf16.msra.mxu1 %v735_v31 }
  0x53   :  { %277 = vmatprep.subr.bf16.mxu0 %v711_v23  ;;  %320 = vmatprep.subr.bf16.mxu1 %v736_v32 }
  0x56   :  { %278 = vmatpush1.bf16.msra.mxu0 %v713_v26  ;;  %321 = vmatpush1.bf16.msra.mxu1 %v738_v33 }
  0x57   :  { %659 = vmatprep.subr.bf16.mxu0 %v739_v34 }
  0x59   :  { %296 = vmatmul.mubr.bf16.vlgmr.msra.gmra.mrb[0].mxu0 %v717_v28  ;;  %339 = vmatmul.mubr.bf16.vlgmr.msra.gmra.mrb[0].mxu1 %v717_v28 }
  0x5a   :  { %660 = vmatpush3.bf16.msra.mxu0 %v740_v35 }
  0x5b   :  { %661 = vmatprep.subr.bf16.mxu0 %v741_v36 }
  0x5e   :  { %662 = vmatpush3.bf16.msra.mxu0 %v742_v37 }
  0x5f   :  { %663 = vmatprep.subr.bf16.mxu0 %v743_v38 }
  0x62   :  { %664 = vmatpush3.bf16.msra.mxu0 %v744_v39 }
  0x63   :  { %665 = vmatprep.subr.bf16.mxu0 %v745_v40 }
  0x66   :  { %666 = vmatpush3.bf16.msra.mxu0 %v746_v41 }
  0x67   :  { %667 = vmatprep.subr.bf16.mxu0 %v747_v42 }
  0x6a   :  { %668 = vmatpush3.bf16.msra.mxu0 %v748_v43 }
  0x6b   :  { %669 = vmatprep.subr.bf16.mxu0 %v749_v44 }
  0x6e   :  { %670 = vmatpush3.bf16.msra.mxu0 %v750_v45 }
  0x6f   :  { %671 = vmatprep.subr.bf16.mxu0 %v751_v46 }
  0x72   :  { %672 = vmatpush3.bf16.msra.mxu0 %v752_v47 }
  0x73   :  { %673 = vmatprep.subr.bf16.mxu0 %v753_v48 }
  0x76   :  { %674 = vmatpush3.bf16.msra.mxu0 %v754_v49 }
 0x12c   :  { %v297_v50 = vpop.f32.mrb[0].mxu0  ;;  %v340_v0 = vpop.f32.mrb[0].mxu1 }
 0x12d   :  { %v299_v51 = vpop.f32.mrb[1].mxu0  ;;  %v342_v1 = vpop.f32.mrb[1].mxu1 }
 0x12e   :  { %v301_v52 = vpop.f32.mrb[2].mxu0  ;;  %v344_v2 = vpop.f32.mrb[2].mxu1 }
 0x12f   :  { %v349_v53 = vpack.c.bf16 %v301_v52, %v297_v50  ;;  %v303_v54 = vpop.f32.mrb[3].mxu0  ;;  %v351_v3 = vpack.c.bf16 %v344_v2, %v340_v0  ;;  %v346_v4 = vpop.f32.mrb[3].mxu1 }
 0x130   :  { %v350_v55 = vpack.c.bf16 %v303_v54, %v299_v51  ;;  %v352_v5 = vpack.c.bf16 %v346_v4, %v342_v1 }
 0x131   :  { %v353_v56 = vunpack.c.l.bf16 %v349_v53  ;;  %v355_v57 = vunpack.c.h.bf16 %v349_v53 }
 0x132   :  { %v354_v58 = vunpack.c.l.bf16 %v350_v55  ;;  %v356_v59 = vunpack.c.h.bf16 %v350_v55 }
 0x133   :  { %v630_v60 = vmul.f32 -1.442695, %v353_v56  ;;  %v632_v61 = vmul.f32 -1.442695, %v355_v57 }
 0x134   :  { %v631_v62 = vmul.f32 -1.442695, %v354_v58  ;;  %v633_v63 = vmul.f32 -1.442695, %v356_v59 }
 0x135   :  { %755 = vpow2.f32 %v630_v60 }
 0x136   :  { %757 = vpow2.f32 %v632_v61 }
 0x137   :  { %759 = vpow2.f32 %v631_v62 }
 0x138   :  { %761 = vpow2.f32 %v633_v63 }
 0x13f   :  { %v756_v6 = vpop.eup %755 }
 0x140   :  { %v758_v7 = vpop.eup %757  ;;  %v369_v8 = vadd.f32 1.0, %v756_v6 }
 0x141   :  { %v760_v9 = vpop.eup %759  ;;  %v371_v10 = vadd.f32 1.0, %v758_v7 }
 0x142   :  { %v762_v11 = vpop.eup %761  ;;  %763 = vrcp.f32 %v369_v8  ;;  %v370_v12 = vadd.f32 1.0, %v760_v9 }
 0x143   :  { %765 = vrcp.f32 %v371_v10  ;;  %v372_v13 = vadd.f32 1.0, %v762_v11 }
 0x144   :  { %767 = vrcp.f32 %v370_v12 }
 0x145   :  { %769 = vrcp.f32 %v372_v13 }
 0x14c   :  { %v764_v14 = vpop.eup %763 }
 0x14d   :  { %v766_v15 = vpop.eup %765  ;;  %v381_v16 = vmul.f32 %v764_v14, %v353_v56 }
 0x14e   :  { %v768_v17 = vpop.eup %767  ;;  %v383_v18 = vmul.f32 %v766_v15, %v355_v57 }
 0x14f   :  { %v770_v19 = vpop.eup %769  ;;  %v382_v20 = vmul.f32 %v768_v17, %v354_v58 }
 0x150   :  { %v384_v21 = vmul.f32 %v770_v19, %v356_v59  ;;  %v385_v22 = vpack.c.bf16 %v383_v18, %v381_v16 }
 0x152   :  { %v387_v23 = vmul.bf16 %v385_v22, %v351_v3  ;;  %v386_v24 = vpack.c.bf16 %v384_v21, %v382_v20 }
 0x154   :  { %v388_v25 = vmul.bf16 %v386_v24, %v352_v5 }
 0x156   :  { %551 = vmatprep.mubr.bf16.mxu0 %v388_v25 }
 0x157   :  { %552 = vmatmul.mubr.bf16.vlgmr.msra.gmra.mrb[4].mxu0 %v387_v23 }
 0x22a   :  { %v675_v26 = vpop.f32.mrb[4].mxu0 }
 0x22b   :  { %v676_v27 = vpop.f32.mrb[5].mxu0 }
 0x22c   :  { %v677_v28 = vadd.f32 %v676_v27, %v675_v26  ;;  %v678_v29 = vpop.f32.mrb[6].mxu0 }
 0x22d   :  { %v679_v30 = vpop.f32.mrb[7].mxu0 }
 0x22e   :  { %v680_v31 = vadd.f32 %v679_v30, %v678_v29 }
 0x230   :  { %v657_v32 = vpack.c.bf16 %v680_v31, %v677_v28 }
 0x232   :  { %658 = vst [vmem:[#allocation9] sm:$0xff] %v657_v32  }
 0x233   :  { %848 = shalt.err (!%p845_p0)
}
 0x234   :  { %s849_s27 = scalar_lea.hbm %s954_s3, 128 }
 0x235   :  { %p850_p1 = scmp.ne.s32.totalorder %s954_s3, %s849_s27  ;;  %p853_p2 = scmp.lt.u32.totalorder %s849_s27, %s954_s3 }
 0x237   :  { %p855_p3 = pnand %p853_p2, %p850_p1 }
 0x239   :  { %858 = shalt.err (!%p855_p3)
}
 0x23a   :  { %590 = dma.vmem_to_hbm [thread:$0]  %s585_s23, 128, %s954_s3, [#allocation5], %s869_s1, %s869_s1, %s870_s9  }
 0x23b   :  { %863 = dma.done.wait [#allocation5], 128  }
 0x23c   :  { %864 = vsyncadd [#allocation5], 4294967168 }
 0x23d   :  { %594 = vsyncpa [#allocation4], 1 }
 0x23e   :  { %595 = vsyncpa [#allocation7], 1 }
 0x23f   :  { %596 = vsyncpa [#allocation5], 1 }

</bundles_post_ra>
